<compile_context>
chip_gen: v6e
topology: v6e:2x2x1
jax: 0.10.0
libtpu: 0.0.40
codegen_flags: <defaults>
</compile_context>

<pallas_src>
import numpy as np
import jax
import jax.numpy as jnp
from jax import lax
from jax.experimental import pallas as pl
from jax.experimental.pallas import tpu as pltpu

BN_EPS = 1e-5                      # BatchNorm1d default eps
_TARGET_BLOCK_BYTES = 4 * 1024 * 1024   # ~4 MiB input block per grid step
_VMEM_LIMIT_BYTES = 32 * 1024 * 1024    # fits 2x(in+out) blocks on v5e/v6e/v7x


def _gbn_kernel(x_ref, gamma_ref, beta_ref, o_ref):
    # x_ref: (G, chunk, TILE_D) -- G independent ghost batches.
    # gamma_ref / beta_ref: (1, 1, TILE_D) shared affine parameters (f32).
    x = x_ref[...].astype(jnp.float32)
    n = x_ref.shape[1]
    inv_n = jnp.float32(1.0 / n)

    # One-pass statistics: sum and sum-of-squares over the chunk (batch) axis.
    s1 = jnp.sum(x, axis=1, keepdims=True)            # (G, 1, TILE_D)
    s2 = jnp.sum(x * x, axis=1, keepdims=True)        # (G, 1, TILE_D)
    mean = s1 * inv_n
    # Biased variance, clamped at 0 to guard rounding in E[x^2] - mean^2.
    var = jnp.maximum(s2 * inv_n - mean * mean, 0.0)

    # Fused affine: y = x * a + b  (2 VALU ops per element on the big tile).
    a = gamma_ref[...] * lax.rsqrt(var + BN_EPS)       # (G, 1, TILE_D)
    b = beta_ref[...] - mean * a                       # (G, 1, TILE_D)
    o_ref[...] = (x * a + b).astype(o_ref.dtype)


def _gbn_chunks(x3, gamma, beta):
    """Normalize each ghost batch independently. x3: (n_chunks, chunk, D)."""
    n_chunks, chunk, D = x3.shape
    itemsize = jnp.dtype(x3.dtype).itemsize

    # Feature-axis tile: only tile when D is 128-aligned and a single-chunk,
    # full-D block would blow the byte budget. Stats are per-feature, so
    # feature tiles are fully independent.
    tile_d = D
    if D % 128 == 0 and chunk * D * itemsize > _TARGET_BLOCK_BYTES:
        tile_d = 128
        while (tile_d * 2 <= 512 and D % (tile_d * 2) == 0
               and chunk * tile_d * 2 * itemsize <= _TARGET_BLOCK_BYTES):
            tile_d *= 2

    # Ghost batches per grid step: biggest count that (a) keeps the input block
    # around the target size and (b) evenly divides n_chunks.
    per_chunk_bytes = chunk * tile_d * itemsize
    g = max(1, min(n_chunks, _TARGET_BLOCK_BYTES // per_chunk_bytes))
    while n_chunks % g != 0:
        g -= 1

    gamma3 = gamma.reshape(1, 1, D).astype(jnp.float32)
    beta3 = beta.reshape(1, 1, D).astype(jnp.float32)

    grid = (n_chunks // g, D // tile_d)

    return pl.pallas_call(
        _gbn_kernel,
        out_shape=jax.ShapeDtypeStruct((n_chunks, chunk, D), x3.dtype),
        grid_spec=pltpu.PrefetchScalarGridSpec(
            num_scalar_prefetch=0,
            grid=grid,
            in_specs=[
                pl.BlockSpec((g, chunk, tile_d), lambda i, j: (i, 0, j)),
                pl.BlockSpec((1, 1, tile_d), lambda i, j: (0, 0, j)),
                pl.BlockSpec((1, 1, tile_d), lambda i, j: (0, 0, j)),
            ],
            out_specs=pl.BlockSpec((g, chunk, tile_d), lambda i, j: (i, 0, j)),
        ),
        compiler_params=pltpu.CompilerParams(
            # Every grid point writes a distinct output block -> both parallel
            # (lets v7x shard the grid across its 2 TensorCores; no-op on
            # v5e/v6e).
            dimension_semantics=("parallel", "parallel"),
            vmem_limit_bytes=_VMEM_LIMIT_BYTES,
        ),
    )(x3, gamma3, beta3)


def gbn_forward(x, gamma, beta, virtual_batch_size=128):
    """Ghost BatchNorm forward. x: (B, D), gamma/beta: (D,)."""
    B, D = x.shape
    n_chunks = -(-B // virtual_batch_size)   # ceil(B / vbs)
    chunk = -(-B // n_chunks)                # torch.chunk chunk size
    n_full = B // chunk
    rem = B - n_full * chunk

    outs = []
    if n_full > 0:
        x_main = x[: n_full * chunk].reshape(n_full, chunk, D)
        y_main = _gbn_chunks(x_main, gamma, beta)
        outs.append(y_main.reshape(n_full * chunk, D))
    if rem > 0:
        # Ragged last chunk (torch.chunk parity): one extra kernel call whose
        # block exactly spans the (rem, D) tail, normalized with its own stats.
        x_tail = x[n_full * chunk:].reshape(1, rem, D)
        y_tail = _gbn_chunks(x_tail, gamma, beta)
        outs.append(y_tail.reshape(rem, D))

    # TODO(synk): running_mean / running_var momentum update (only used in
    # eval mode, does not affect this training-mode forward output) is not
    # implemented.
    return outs[0] if len(outs) == 1 else jnp.concatenate(outs, axis=0)


def gbn_reference(x, gamma, beta, virtual_batch_size=128):
    """Pure-JAX reference (two-pass stats) with torch.chunk semantics."""
    B, D = x.shape
    n_chunks = int(np.ceil(B / virtual_batch_size))
    chunk = int(np.ceil(B / n_chunks))
    outs = []
    for start in range(0, B, chunk):
        c = x[start:start + chunk].astype(jnp.float32)
        mean = jnp.mean(c, axis=0, keepdims=True)
        var = jnp.mean((c - mean) ** 2, axis=0, keepdims=True)
        y = (c - mean) / jnp.sqrt(var + BN_EPS) * gamma + beta
        outs.append(y.astype(x.dtype))
    return jnp.concatenate(outs, axis=0)


if __name__ == "__main__":
    key = jax.random.PRNGKey(0)
    D = 16
    vbs = 128

    # BatchNorm1d default affine init (deterministic): weight=1, bias=0.
    gamma = jnp.ones((D,), dtype=jnp.float32)
    beta = jnp.zeros((D,), dtype=jnp.float32)

    # Case 1: B divides evenly into ghost batches (2 ghost batches of 128,
    # both processed in a single grid step).
    k1, k2 = jax.random.split(key)
    x1 = jax.random.normal(k1, (256, D), dtype=jnp.float32) * 2.0 + 0.5
    out1 = jax.block_until_ready(gbn_forward(x1, gamma, beta, vbs))
    ref1 = gbn_reference(x1, gamma, beta, vbs)
    np.testing.assert_allclose(np.asarray(out1), np.asarray(ref1),
                               rtol=5e-5, atol=5e-5)

    # Case 2: ragged split (torch.chunk gives chunks of 66 and 65 rows).
    x2 = jax.random.normal(k2, (131, D), dtype=jnp.float32) * 1.5 - 0.25
    out2 = jax.block_until_ready(gbn_forward(x2, gamma, beta, vbs))
    ref2 = gbn_reference(x2, gamma, beta, vbs)
    np.testing.assert_allclose(np.asarray(out2), np.asarray(ref2),
                               rtol=5e-5, atol=5e-5)

    print("KERNEL_OK")
</pallas_src>

<mosaic_0001>
module attributes {stable_mosaic.version = 11 : i64} {
  func.func @_gbn_kernel(%arg0: i32, %arg1: i32, %arg2: memref<2x128x16xf32, #tpu.memory_space<vmem>>, %arg3: memref<1x1x16xf32, #tpu.memory_space<vmem>>, %arg4: memref<1x1x16xf32, #tpu.memory_space<vmem>>, %arg5: memref<2x128x16xf32, #tpu.memory_space<vmem>>) attributes {dimension_semantics = [#tpu.dimension_semantics<parallel>, #tpu.dimension_semantics<parallel>], iteration_bounds = array<i64: 1, 1>, scalar_prefetch = 0 : i64, scratch_operands = 0 : i64, tpu.core_type = #tpu.core_type<tc>, window_params = [{transform_indices = @transform_0, window_bounds = array<i64: 2, 128, 16>}, {transform_indices = @transform_1, window_bounds = array<i64: 1, 1, 16>}, {transform_indices = @transform_2, window_bounds = array<i64: 1, 1, 16>}, {transform_indices = @transform_3, window_bounds = array<i64: 2, 128, 16>}]} {
    %c0 = arith.constant 0 : index
    %c0_0 = arith.constant 0 : index
    %c0_1 = arith.constant 0 : index
    %0 = vector.load %arg2[%c0, %c0_0, %c0_1] : memref<2x128x16xf32, #tpu.memory_space<vmem>>, vector<2x128x16xf32>
    %cst = arith.constant dense<0.000000e+00> : vector<2x16xf32>
    %1 = vector.multi_reduction <add>, %0, %cst [1] : vector<2x128x16xf32> to vector<2x16xf32>
    %2 = vector.shape_cast %1 : vector<2x16xf32> to vector<2x1x16xf32>
    %3 = arith.mulf %0, %0 : vector<2x128x16xf32>
    %cst_2 = arith.constant dense<0.000000e+00> : vector<2x16xf32>
    %4 = vector.multi_reduction <add>, %3, %cst_2 [1] : vector<2x128x16xf32> to vector<2x16xf32>
    %5 = vector.shape_cast %4 : vector<2x16xf32> to vector<2x1x16xf32>
    %cst_3 = arith.constant 7.812500e-03 : f32
    %6 = vector.broadcast %cst_3 : f32 to vector<2x1x16xf32>
    %7 = arith.mulf %2, %6 : vector<2x1x16xf32>
    %cst_4 = arith.constant 7.812500e-03 : f32
    %8 = vector.broadcast %cst_4 : f32 to vector<2x1x16xf32>
    %9 = arith.mulf %5, %8 : vector<2x1x16xf32>
    %10 = arith.mulf %7, %7 : vector<2x1x16xf32>
    %11 = arith.subf %9, %10 : vector<2x1x16xf32>
    %cst_5 = arith.constant 0.000000e+00 : f32
    %12 = vector.broadcast %cst_5 : f32 to vector<2x1x16xf32>
    %13 = arith.maximumf %11, %12 : vector<2x1x16xf32>
    %c0_6 = arith.constant 0 : index
    %c0_7 = arith.constant 0 : index
    %c0_8 = arith.constant 0 : index
    %14 = vector.load %arg3[%c0_6, %c0_7, %c0_8] : memref<1x1x16xf32, #tpu.memory_space<vmem>>, vector<1x1x16xf32>
    %cst_9 = arith.constant 9.99999974E-6 : f32
    %15 = vector.broadcast %cst_9 : f32 to vector<2x1x16xf32>
    %16 = arith.addf %13, %15 : vector<2x1x16xf32>
    %17 = math.rsqrt %16 : vector<2x1x16xf32>
    %18 = vector.broadcast %14 : vector<1x1x16xf32> to vector<2x1x16xf32>
    %19 = arith.mulf %18, %17 : vector<2x1x16xf32>
    %c0_10 = arith.constant 0 : index
    %c0_11 = arith.constant 0 : index
    %c0_12 = arith.constant 0 : index
    %20 = vector.load %arg4[%c0_10, %c0_11, %c0_12] : memref<1x1x16xf32, #tpu.memory_space<vmem>>, vector<1x1x16xf32>
    %21 = arith.mulf %7, %19 : vector<2x1x16xf32>
    %22 = vector.broadcast %20 : vector<1x1x16xf32> to vector<2x1x16xf32>
    %23 = arith.subf %22, %21 : vector<2x1x16xf32>
    %24 = vector.broadcast %19 : vector<2x1x16xf32> to vector<2x128x16xf32>
    %25 = arith.mulf %0, %24 : vector<2x128x16xf32>
    %26 = vector.broadcast %23 : vector<2x1x16xf32> to vector<2x128x16xf32>
    %27 = arith.addf %25, %26 : vector<2x128x16xf32>
    %c0_13 = arith.constant 0 : index
    %c0_14 = arith.constant 0 : index
    %c0_15 = arith.constant 0 : index
    %28 = vector.load %arg5[%c0_13, %c0_14, %c0_15] : memref<2x128x16xf32, #tpu.memory_space<vmem>>, vector<2x128x16xf32>
    tpu.vector_store %arg5[%c0_13, %c0_14, %c0_15], %27 {strides = array<i32>} : memref<2x128x16xf32, #tpu.memory_space<vmem>>, vector<2x128x16xf32>,
    return
  }
  func.func @transform_0(%arg0: i32, %arg1: i32) -> (i32, i32, i32) {
    %c0_i32 = arith.constant 0 : i32
    %c0_i32_0 = arith.constant 0 : i32
    return %arg0, %c0_i32, %arg1 : i32, i32, i32
  }
  func.func @transform_1(%arg0: i32, %arg1: i32) -> (i32, i32, i32) {
    %c0_i32 = arith.constant 0 : i32
    %c0_i32_0 = arith.constant 0 : i32
    %c0_i32_1 = arith.constant 0 : i32
    return %c0_i32, %c0_i32_0, %arg1 : i32, i32, i32
  }
  func.func @transform_2(%arg0: i32, %arg1: i32) -> (i32, i32, i32) {
    %c0_i32 = arith.constant 0 : i32
    %c0_i32_0 = arith.constant 0 : i32
    %c0_i32_1 = arith.constant 0 : i32
    return %c0_i32, %c0_i32_0, %arg1 : i32, i32, i32
  }
  func.func @transform_3(%arg0: i32, %arg1: i32) -> (i32, i32, i32) {
    %c0_i32 = arith.constant 0 : i32
    %c0_i32_0 = arith.constant 0 : i32
    return %arg0, %c0_i32, %arg1 : i32, i32, i32
  }
}

</mosaic_0001>

<bundles_post_ra>
// kernel: tpu_custom_call.1
= control target key start
LH: loop header
LB: loop body
LE: loop exit
PB: predicated region body
PF: predicated region fallthrough
CT: control target
= control target key end

     0   :  { %vm46_vm0 = vcmask 130048   ;;  %s902_s0 = inlined_call_operand.vmem [shape: f32[2,128,16], index: 0, kind: input, shape index: {}]   ;;  %s903_s1 = inlined_call_operand.vmem [shape: f32[1,1,16], index: 1, kind: input, shape index: {}]   ;;  %s904_s2 = inlined_call_operand.vmem [shape: f32[1,1,16], index: 2, kind: input, shape index: {}]   ;;  %s905_s3 = inlined_call_operand.vmem [shape: f32[2,128,16], index: 3, kind: output, shape index: {}]  }
   0x1   :  { %v400_v0 = vld [vmem:[%s902_s0] sm:$0xff]  ;;  %v405_v1 = vld [vmem:[%s902_s0 + $0x8] sm:$0xff]  ;;  %v410_v2 = vld [vmem:[%s902_s0 + $0x10] sm:$0xff] }
   0x2   :  { %v415_v3 = vld [vmem:[%s902_s0 + $0x18] sm:$0xff]  ;;  %v47_v4 = vsel %vm46_vm0, %v400_v0, 0.0  ;;  %v48_v5 = vsel %vm46_vm0, %v405_v1, 0.0  ;;  %v50_v6 = vsel %vm46_vm0, %v410_v2, 0.0  ;;  %v426_v7 = vld [vmem:[%s902_s0 + $0x20] sm:$0xff]  ;;  %v433_v10 = vld [vmem:[%s902_s0 + $0x28] sm:$0xff]  ;;  %v121_v15 = vmul.f32 %v400_v0, %v400_v0 }
   0x3   :  { %v49_v8 = vadd.f32 %v48_v5, %v47_v4  ;;  %v52_v9 = vsel %vm46_vm0, %v415_v3, 0.0  ;;  %v54_v12 = vsel %vm46_vm0, %v426_v7, 0.0  ;;  %v440_v13 = vld [vmem:[%s902_s0 + $0x30] sm:$0xff]  ;;  %v122_v16 = vmul.f32 %v405_v1, %v405_v1  ;;  %v453_v19 = vld [vmem:[%s902_s0 + $0x38] sm:$0xff]  ;;  %v464_v24 = vld [vmem:[%s902_s0 + $0x40] sm:$0xff] }
   0x4   :  { %v123_v17 = vmul.f32 %v410_v2, %v410_v2  ;;  %v56_v18 = vsel %vm46_vm0, %v433_v10, 0.0  ;;  %v124_v21 = vmul.f32 %v415_v3, %v415_v3  ;;  %v58_v22 = vsel %vm46_vm0, %v440_v13, 0.0  ;;  %v469_v25 = vld [vmem:[%s902_s0 + $0x48] sm:$0xff]  ;;  %v477_v30 = vld [vmem:[%s902_s0 + $0x50] sm:$0xff]  ;;  %v484_v33 = vld [vmem:[%s902_s0 + $0x58] sm:$0xff] }
   0x5   :  { %v51_v11 = vadd.f32 %v50_v6, %v49_v8  ;;  %v125_v23 = vmul.f32 %v426_v7, %v426_v7  ;;  %v153_v27 = vsel %vm46_vm0, %v121_v15, 0.0  ;;  %v154_v28 = vsel %vm46_vm0, %v122_v16, 0.0  ;;  %v492_v37 = vld [vmem:[%s902_s0 + $0x80] sm:$0xff]  ;;  %v501_v41 = vld [vmem:[%s902_s0 + $0x88] sm:$0xff]  ;;  %v506_v42 = vld [vmem:[%s902_s0 + $0x90] sm:$0xff] }
   0x6   :  { %v156_v29 = vsel %vm46_vm0, %v123_v17, 0.0  ;;  %v60_v31 = vsel %vm46_vm0, %v453_v19, 0.0  ;;  %v155_v32 = vadd.f32 %v154_v28, %v153_v27  ;;  %v126_v35 = vmul.f32 %v433_v10, %v433_v10  ;;  %v511_v43 = vld [vmem:[%s902_s0 + $0x60] sm:$0xff]  ;;  %v516_v44 = vld [vmem:[%s902_s0 + $0x68] sm:$0xff]  ;;  %v530_v52 = vld [vmem:[%s902_s0 + $0x98] sm:$0xff] }
   0x7   :  { %v53_v14 = vadd.f32 %v52_v9, %v51_v11  ;;  %v158_v36 = vsel %vm46_vm0, %v124_v21, 0.0  ;;  %v62_v38 = vsel %vm46_vm0, %v464_v24, 0.0  ;;  %v64_v39 = vsel %vm46_vm0, %v469_v25, 0.0  ;;  %v537_v54 = vld [vmem:[%s902_s0 + $0x70] sm:$0xff]  ;;  %v542_v55 = vld [vmem:[%s902_s0 + $0x78] sm:$0xff]  ;;  %v556_v63 = vld [vmem:[%s902_s0 + $0xa0] sm:$0xff] }
   0x8   :  { %v157_v40 = vadd.f32 %v156_v29, %v155_v32  ;;  %v66_v46 = vsel %vm46_vm0, %v477_v30, 0.0  ;;  %v127_v47 = vmul.f32 %v440_v13, %v440_v13  ;;  %v160_v48 = vsel %vm46_vm0, %v125_v23, 0.0  ;;  %v570_v15 = vld [vmem:[%s902_s0 + $0xa8] sm:$0xff]  ;;  %v584_v27 = vld [vmem:[%s902_s0 + $0xb0] sm:$0xff] }
   0x9   :  { %v55_v20 = vadd.f32 %v54_v12, %v53_v14  ;;  %v68_v49 = vsel %vm46_vm0, %v484_v33, 0.0  ;;  %v128_v50 = vmul.f32 %v453_v19, %v453_v19  ;;  %v84_v53 = vsel %vm46_vm0, %v492_v37, 0.0 }
   0xa   :  { %v159_v51 = vadd.f32 %v158_v36, %v157_v40  ;;  %v162_v57 = vsel %vm46_vm0, %v126_v35, 0.0  ;;  %v85_v58 = vsel %vm46_vm0, %v501_v41, 0.0  ;;  %v87_v59 = vsel %vm46_vm0, %v506_v42, 0.0 }
   0xb   :  { %v57_v26 = vadd.f32 %v56_v18, %v55_v20  ;;  %v70_v60 = vsel %vm46_vm0, %v511_v43, 0.0  ;;  %v72_v61 = vsel %vm46_vm0, %v516_v44, 0.0  ;;  %v86_v4 = vadd.f32 %v85_v58, %v84_v53 }
   0xc   :  { %v161_v62 = vadd.f32 %v160_v48, %v159_v51  ;;  %v129_v6 = vmul.f32 %v464_v24, %v464_v24  ;;  %v164_v8 = vsel %vm46_vm0, %v127_v47, 0.0  ;;  %v89_v9 = vsel %vm46_vm0, %v530_v52, 0.0 }
   0xd   :  { %v59_v34 = vadd.f32 %v58_v22, %v57_v26  ;;  %v74_v11 = vsel %vm46_vm0, %v537_v54, 0.0  ;;  %v76_v12 = vsel %vm46_vm0, %v542_v55, 0.0  ;;  %v88_v16 = vadd.f32 %v87_v59, %v86_v4 }
   0xe   :  { %v163_v14 = vadd.f32 %v162_v57, %v161_v62  ;;  %v130_v18 = vmul.f32 %v469_v25, %v469_v25  ;;  %v166_v20 = vsel %vm46_vm0, %v128_v50, 0.0  ;;  %v91_v21 = vsel %vm46_vm0, %v556_v63, 0.0  ;;  %v608_v50 = vld [vmem:[%s902_s0 + $0xc0] sm:$0xff] }
   0xf   :  { %v61_v45 = vadd.f32 %v60_v31, %v59_v34  ;;  %v131_v22 = vmul.f32 %v477_v30, %v477_v30  ;;  %v132_v23 = vmul.f32 %v484_v33, %v484_v33  ;;  %v90_v28 = vadd.f32 %v89_v9, %v88_v16 }
  0x10   :  { %v165_v26 = vadd.f32 %v164_v8, %v163_v14  ;;  %v133_v31 = vmul.f32 %v511_v43, %v511_v43  ;;  %v168_v32 = vsel %vm46_vm0, %v129_v6, 0.0  ;;  %v93_v34 = vsel %vm46_vm0, %v570_v15, 0.0 }
  0x11   :  { %v63_v56 = vadd.f32 %v62_v38, %v61_v45  ;;  %v134_v35 = vmul.f32 %v516_v44, %v516_v44  ;;  %v135_v36 = vmul.f32 %v537_v54, %v537_v54  ;;  %v92_v40 = vadd.f32 %v91_v21, %v90_v28 }
  0x12   :  { %v167_v38 = vadd.f32 %v166_v20, %v165_v26  ;;  %v95_v47 = vsel %vm46_vm0, %v584_v27, 0.0  ;;  %v137_v48 = vmul.f32 %v492_v37, %v492_v37  ;;  %v138_v53 = vmul.f32 %v501_v41, %v501_v41 }
  0x13   :  { %v65_v5 = vadd.f32 %v64_v39, %v63_v56  ;;  %v598_v39 = vld [vmem:[%s902_s0 + $0xb8] sm:$0xff]  ;;  %v94_v51 = vadd.f32 %v93_v34, %v92_v40  ;;  %v139_v56 = vmul.f32 %v506_v42, %v506_v42  ;;  %v136_v58 = vmul.f32 %v542_v55, %v542_v55 }
  0x14   :  { %v172_v59 = vsel %vm46_vm0, %v131_v22, 0.0  ;;  %v174_v4 = vsel %vm46_vm0, %v132_v23, 0.0  ;;  %v99_v9 = vsel %vm46_vm0, %v608_v50, 0.0  ;;  %v141_v14 = vmul.f32 %v556_v63, %v556_v63 }
  0x15   :  { %v67_v17 = vadd.f32 %v66_v46, %v65_v5  ;;  %v170_v46 = vsel %vm46_vm0, %v130_v18, 0.0  ;;  %v623_v5 = vld [vmem:[%s902_s0 + $0xc8] sm:$0xff]  ;;  %v96_v6 = vadd.f32 %v95_v47, %v94_v51  ;;  %v190_v16 = vsel %vm46_vm0, %v137_v48, 0.0  ;;  %v635_v18 = vld [vmem:[%s902_s0 + $0xd0] sm:$0xff]  ;;  %v656_v48 = vld [vmem:[%s902_s0 + $0xe0] sm:$0xff] }
  0x16   :  { %v191_v21 = vsel %vm46_vm0, %v138_v53, 0.0  ;;  %v193_v22 = vsel %vm46_vm0, %v139_v56, 0.0  ;;  %v176_v23 = vsel %vm46_vm0, %v133_v31, 0.0  ;;  %v101_v26 = vsel %vm46_vm0, %v623_v5, 0.0 }
  0x17   :  { %v69_v29 = vadd.f32 %v68_v49, %v67_v17  ;;  %v169_v49 = vadd.f32 %v168_v32, %v167_v38  ;;  %v192_v28 = vadd.f32 %v191_v21, %v190_v16  ;;  %v645_v32 = vld [vmem:[%s902_s0 + $0xd8] sm:$0xff]  ;;  %v142_v38 = vmul.f32 %v570_v15, %v570_v15 }
  0x18   :  { %v103_v31 = vsel %vm46_vm0, %v635_v18, 0.0  ;;  %v143_v51 = vmul.f32 %v584_v27, %v584_v27  ;;  %v197_v53 = vsel %vm46_vm0, %v141_v14, 0.0  ;;  %v145_v21 = vmul.f32 %v608_v50, %v608_v50 }
  0x19   :  { %v71_v45 = vadd.f32 %v70_v60, %v69_v29  ;;  %v97_v60 = vsel %vm46_vm0, %v598_v39, 0.0  ;;  %v171_v62 = vadd.f32 %v170_v46, %v169_v49  ;;  %v194_v46 = vadd.f32 %v193_v22, %v192_v28  ;;  %v688_v28 = vld [vmem:[%s902_s0 + $0xf8] sm:$0xff] }
  0x1a   :  { %v98_v20 = vadd.f32 %v97_v60, %v96_v6  ;;  %v144_v6 = vmul.f32 %v598_v39, %v598_v39  ;;  %v201_v22 = vsel %vm46_vm0, %v143_v51, 0.0  ;;  %v113_v51 = vsel %vm46_vm0, %v688_v28, 0.0 }
  0x1b   :  { %v73_v57 = vadd.f32 %v72_v61, %v71_v45  ;;  %v140_v61 = vmul.f32 %v530_v52, %v530_v52  ;;  %v173_v17 = vadd.f32 %v172_v59, %v171_v62  ;;  %v667_v62 = vld [vmem:[%s902_s0 + $0xe8] sm:$0xff] }
  0x1c   :  { %v100_v34 = vadd.f32 %v99_v9, %v98_v20  ;;  %v182_v9 = vsel %vm46_vm0, %v136_v58, 0.0  ;;  %v109_v58 = vsel %vm46_vm0, %v667_v62, 0.0 }
  0x1d   :  { %v75_v8 = vadd.f32 %v74_v11, %v73_v57  ;;  %v175_v29 = vadd.f32 %v174_v4, %v173_v17  ;;  %v195_v40 = vsel %vm46_vm0, %v140_v61, 0.0  ;;  %v180_v57 = vsel %vm46_vm0, %v135_v36, 0.0  ;;  %v678_v17 = vld [vmem:[%s902_s0 + $0xf0] sm:$0xff] }
  0x1e   :  { %v102_v49 = vadd.f32 %v101_v26, %v100_v34  ;;  %v196_v59 = vadd.f32 %v195_v40, %v194_v46  ;;  %v199_v61 = vsel %vm46_vm0, %v142_v38, 0.0  ;;  %v107_v36 = vsel %vm46_vm0, %v656_v48, 0.0 }
  0x1f   :  { %v77_v11 = vadd.f32 %v76_v12, %v75_v8  ;;  %v178_v12 = vsel %vm46_vm0, %v134_v35, 0.0  ;;  %v177_v47 = vadd.f32 %v176_v23, %v175_v29  ;;  %v105_v35 = vsel %vm46_vm0, %v645_v32, 0.0 }
  0x20   :  { %v104_v4 = vadd.f32 %v103_v31, %v102_v49  ;;  %v198_v14 = vadd.f32 %v197_v53, %v196_v59  ;;  %v146_v34 = vmul.f32 %v623_v5, %v623_v5  ;;  %v203_v38 = vsel %vm46_vm0, %v144_v6, 0.0 }
  0x21   :  { %v78_v45 = vrot.slane %v77_v11, 4  ;;  %v179_v60 = vadd.f32 %v178_v12, %v177_v47  ;;  %v147_v47 = vmul.f32 %v635_v18, %v635_v18  ;;  %v205_v49 = vsel %vm46_vm0, %v145_v21, 0.0 }
  0x22   :  { %v106_v20 = vadd.f32 %v105_v35, %v104_v4  ;;  %v200_v23 = vadd.f32 %v199_v61, %v198_v14  ;;  %v148_v53 = vmul.f32 %v645_v32, %v645_v32 }
  0x23   :  { %v79_v56 = vadd.f32 %v78_v45, %v77_v11  ;;  %v181_v16 = vadd.f32 %v180_v57, %v179_v60  ;;  %v111_v45 = vsel %vm46_vm0, %v678_v17, 0.0  ;;  %v207_v60 = vsel %vm46_vm0, %v146_v34, 0.0 }
  0x24   :  { %v108_v29 = vadd.f32 %v107_v36, %v106_v20  ;;  %v202_v12 = vadd.f32 %v201_v22, %v200_v23  ;;  %v150_v36 = vmul.f32 %v667_v62, %v667_v62  ;;  %v211_v22 = vsel %vm46_vm0, %v148_v53, 0.0 }
  0x25   :  { %v80_v8 = vrot.slane %v79_v56, 2  ;;  %v183_v26 = vadd.f32 %v182_v9, %v181_v16  ;;  %v209_v9 = vsel %vm46_vm0, %v147_v47, 0.0  ;;  %v152_v34 = vmul.f32 %v688_v28, %v688_v28 }
  0x26   :  { %v110_v46 = vadd.f32 %v109_v58, %v108_v29 }
  0x27   :  { %v81_v11 = vadd.f32 %v80_v8, %v79_v56  ;;  %v184_v31 = vrot.slane %v183_v26, 4  ;;  %v204_v56 = vadd.f32 %v203_v38, %v202_v12  ;;  %v149_v8 = vmul.f32 %v656_v48, %v656_v48 }
  0x28   :  { %v112_v59 = vadd.f32 %v111_v45, %v110_v46 }
  0x29   :  { %v82_v40 = vrot.slane %v81_v11, 1  ;;  %v185_v35 = vadd.f32 %v184_v31, %v183_v26  ;;  %v206_v4 = vadd.f32 %v205_v49, %v204_v56  ;;  %v151_v26 = vmul.f32 %v678_v17, %v678_v17 }
  0x2a   :  { %v114_v61 = vadd.f32 %v113_v51, %v112_v59  ;;  %v213_v29 = vsel %vm46_vm0, %v149_v8, 0.0  ;;  %v215_v31 = vsel %vm46_vm0, %v150_v36, 0.0  ;;  %v251_v36 = vlaneseq }
  0x2b   :  { %v83_v57 = vadd.f32 %v82_v40, %v81_v11  ;;  %v186_v6 = vrot.slane %v185_v35, 2  ;;  %v208_v14 = vadd.f32 %v207_v60, %v206_v4  ;;  %v217_v49 = vsel %vm46_vm0, %v151_v26, 0.0  ;;  %v724_v26 = vld [vmem:[%s903_s1] sm:$0x1] }
  0x2c   :  { %v115_v21 = vrot.slane %v114_v61, 4 }
  0x2d   :  { %v187_v16 = vadd.f32 %v186_v6, %v185_v35  ;;  %v227_v20 = vmul.f32 0.0078125, %v83_v57  ;;  %v210_v11 = vadd.f32 %v209_v9, %v208_v14  ;;  %v219_v57 = vsel %vm46_vm0, %v152_v34, 0.0 }
  0x2e   :  { %v116_v23 = vadd.f32 %v115_v21, %v114_v61 }
  0x2f   :  { %v188_v58 = vrot.slane %v187_v16, 1  ;;  %v212_v38 = vadd.f32 %v211_v22, %v210_v11  ;;  %v231_v45 = vmul.f32 %v227_v20, %v227_v20  ;;  %v252_v11 = vshrl.u32 %v251_v36, 7 }
  0x30   :  { %v117_v12 = vrot.slane %v116_v23, 2 }
  0x31   :  { %v189_v40 = vadd.f32 %v188_v58, %v187_v16  ;;  %v214_v46 = vadd.f32 %v213_v29, %v212_v38  ;;  %v726_v34 = vsub.s32 0, %v252_v11 }
  0x32   :  { %v118_v51 = vadd.f32 %v117_v12, %v116_v23  ;;  %v732_v12 = vld [vmem:[%s904_s2] sm:$0x1] }
  0x33   :  { %v229_v47 = vmul.f32 0.0078125, %v189_v40  ;;  %v216_v53 = vadd.f32 %v215_v31, %v214_v46 }
  0x34   :  { %v119_v60 = vrot.slane %v118_v51, 1 }
  0x35   :  { %v233_v56 = vsub.f32 %v229_v47, %v231_v45  ;;  %v218_v35 = vadd.f32 %v217_v49, %v216_v53 }
  0x36   :  { %v120_v8 = vadd.f32 %v119_v60, %v118_v51 }
  0x37   :  { %v235_v59 = vmax.f32 %v233_v56, 0.0  ;;  %v220_v4 = vadd.f32 %v219_v57, %v218_v35 }
  0x38   :  { %v717_v21 = vmul.f32 0.0078125, %v120_v8 }
  0x39   :  { %v238_v6 = vadd.f32 1e-05, %v235_v59  ;;  %v221_v61 = vrot.slane %v220_v4, 4 }
  0x3a   :  { %v232_v23 = vmul.f32 %v717_v21, %v717_v21 }
  0x3b   :  { %373 = vrsqrt.f32 %v238_v6  ;;  %v222_v9 = vadd.f32 %v221_v61, %v220_v4 }
  0x3d   :  { %v223_v14 = vrot.slane %v222_v9, 2 }
  0x3f   :  { %v224_v16 = vadd.f32 %v223_v14, %v222_v9 }
  0x41   :  { %v225_v22 = vrot.slane %v224_v16, 1 }
  0x43   :  { %v226_v58 = vadd.f32 %v225_v22, %v224_v16 }
  0x45   :  { %v230_v29 = vmul.f32 0.0078125, %v226_v58 }
  0x47   :  { %v234_v40 = vsub.f32 %v230_v29, %v232_v23 }
  0x48   :  { %v374_v38 = vpop.eup %373 }
  0x49   :  { %v242_v45 = vmul.f32 %v374_v38, %v724_v26  ;;  %v236_v31 = vmax.f32 %v234_v40, 0.0 }
  0x4b   :  { %v245_v46 = vmul.f32 %v242_v45, %v227_v20  ;;  %v254_v47 = vrot.slane %v242_v45, %v726_v34  ;;  %v239_v49 = vadd.f32 1e-05, %v236_v31 }
  0x4d   :  { %v247_v51 = vsub.f32 %v732_v12, %v245_v46  ;;  %v261_v53 = vmul.f32 %v254_v47, %v400_v0  ;;  %v262_v56 = vmul.f32 %v254_v47, %v405_v1  ;;  %v263_v57 = vmul.f32 %v254_v47, %v410_v2 }
  0x4e   :  { %v264_v35 = vmul.f32 %v254_v47, %v415_v3  ;;  %v265_v59 = vmul.f32 %v254_v47, %v426_v7  ;;  %v266_v60 = vmul.f32 %v254_v47, %v433_v10  ;;  %v267_v4 = vmul.f32 %v254_v47, %v440_v13 }
  0x4f   :  { %v298_v20 = vrot.slane %v247_v51, %v726_v34  ;;  %v268_v6 = vmul.f32 %v254_v47, %v453_v19  ;;  %v269_v61 = vmul.f32 %v254_v47, %v464_v24  ;;  %v270_v0 = vmul.f32 %v254_v47, %v469_v25 }
  0x50   :  { %v271_v1 = vmul.f32 %v254_v47, %v477_v30  ;;  %v272_v2 = vmul.f32 %v254_v47, %v484_v33  ;;  %v273_v3 = vmul.f32 %v254_v47, %v511_v43  ;;  %v274_v7 = vmul.f32 %v254_v47, %v516_v44 }
  0x51   :  { %v305_v8 = vadd.f32 %v298_v20, %v261_v53  ;;  %v306_v10 = vadd.f32 %v298_v20, %v262_v56  ;;  %v307_v9 = vadd.f32 %v298_v20, %v263_v57  ;;  %v308_v13 = vadd.f32 %v298_v20, %v264_v35 }
  0x52   :  { %v309_v14 = vadd.f32 %v298_v20, %v265_v59  ;;  %v310_v36 = vadd.f32 %v298_v20, %v266_v60  ;;  %v311_v16 = vadd.f32 %v298_v20, %v267_v4  ;;  %v312_v19 = vadd.f32 %v298_v20, %v268_v6 }
  0x53   :  { %337 = vst.msk [vmem:[%s905_s3] sm:$0xff] %vm46_vm0, %v305_v8  ;;  %338 = vst.msk [vmem:[%s905_s3 + $0x8] sm:$0xff] %vm46_vm0, %v306_v10  ;;  %v313_v24 = vadd.f32 %v298_v20, %v269_v61  ;;  %v314_v25 = vadd.f32 %v298_v20, %v270_v0  ;;  %v315_v30 = vadd.f32 %v298_v20, %v271_v1  ;;  %375 = vrsqrt.f32 %v239_v49 }
  0x54   :  { %339 = vst.msk [vmem:[%s905_s3 + $0x10] sm:$0xff] %vm46_vm0, %v307_v9  ;;  %340 = vst.msk [vmem:[%s905_s3 + $0x18] sm:$0xff] %vm46_vm0, %v308_v13  ;;  %v316_v33 = vadd.f32 %v298_v20, %v272_v2  ;;  %v317_v43 = vadd.f32 %v298_v20, %v273_v3  ;;  %v318_v44 = vadd.f32 %v298_v20, %v274_v7 }
  0x55   :  { %341 = vst.msk [vmem:[%s905_s3 + $0x20] sm:$0xff] %vm46_vm0, %v309_v14  ;;  %342 = vst.msk [vmem:[%s905_s3 + $0x28] sm:$0xff] %vm46_vm0, %v310_v36  ;;  %v275_v22 = vmul.f32 %v254_v47, %v537_v54  ;;  %v276_v11 = vmul.f32 %v254_v47, %v542_v55 }
  0x56   :  { %343 = vst.msk [vmem:[%s905_s3 + $0x30] sm:$0xff] %vm46_vm0, %v311_v16  ;;  %344 = vst.msk [vmem:[%s905_s3 + $0x38] sm:$0xff] %vm46_vm0, %v312_v19 }
  0x57   :  { %345 = vst.msk [vmem:[%s905_s3 + $0x40] sm:$0xff] %vm46_vm0, %v313_v24  ;;  %346 = vst.msk [vmem:[%s905_s3 + $0x48] sm:$0xff] %vm46_vm0, %v314_v25  ;;  %v319_v54 = vadd.f32 %v298_v20, %v275_v22  ;;  %v320_v55 = vadd.f32 %v298_v20, %v276_v11 }
  0x58   :  { %347 = vst.msk [vmem:[%s905_s3 + $0x50] sm:$0xff] %vm46_vm0, %v315_v30  ;;  %348 = vst.msk [vmem:[%s905_s3 + $0x58] sm:$0xff] %vm46_vm0, %v316_v33 }
  0x59   :  { %349 = vst.msk [vmem:[%s905_s3 + $0x60] sm:$0xff] %vm46_vm0, %v317_v43  ;;  %350 = vst.msk [vmem:[%s905_s3 + $0x68] sm:$0xff] %vm46_vm0, %v318_v44 }
  0x5a   :  { %351 = vst.msk [vmem:[%s905_s3 + $0x70] sm:$0xff] %vm46_vm0, %v319_v54  ;;  %352 = vst.msk [vmem:[%s905_s3 + $0x78] sm:$0xff] %vm46_vm0, %v320_v55 }
  0x60   :  { %v376_v58 = vpop.eup %375 }
  0x61   :  { %v243_v23 = vmul.f32 %v376_v58, %v724_v26 }
  0x63   :  { %v246_v29 = vmul.f32 %v243_v23, %v717_v21  ;;  %v258_v38 = vrot.slane %v243_v23, %v726_v34 }
  0x65   :  { %v248_v40 = vsub.f32 %v732_v12, %v246_v29  ;;  %v277_v45 = vmul.f32 %v258_v38, %v492_v37  ;;  %v278_v31 = vmul.f32 %v258_v38, %v501_v41  ;;  %v279_v46 = vmul.f32 %v258_v38, %v506_v42 }
  0x66   :  { %v280_v47 = vmul.f32 %v258_v38, %v530_v52  ;;  %v281_v49 = vmul.f32 %v258_v38, %v556_v63  ;;  %v282_v51 = vmul.f32 %v258_v38, %v570_v15  ;;  %v283_v26 = vmul.f32 %v258_v38, %v584_v27 }
  0x67   :  { %v302_v21 = vrot.slane %v248_v40, %v726_v34  ;;  %v284_v53 = vmul.f32 %v258_v38, %v598_v39  ;;  %v285_v12 = vmul.f32 %v258_v38, %v608_v50  ;;  %v286_v37 = vmul.f32 %v258_v38, %v623_v5 }
  0x68   :  { %v287_v41 = vmul.f32 %v258_v38, %v635_v18  ;;  %v288_v42 = vmul.f32 %v258_v38, %v645_v32  ;;  %v289_v52 = vmul.f32 %v258_v38, %v656_v48  ;;  %v290_v63 = vmul.f32 %v258_v38, %v667_v62 }
  0x69   :  { %v321_v56 = vadd.f32 %v302_v21, %v277_v45  ;;  %v322_v15 = vadd.f32 %v302_v21, %v278_v31  ;;  %v323_v57 = vadd.f32 %v302_v21, %v279_v46  ;;  %v324_v27 = vadd.f32 %v302_v21, %v280_v47 }
  0x6a   :  { %v325_v35 = vadd.f32 %v302_v21, %v281_v49  ;;  %v326_v34 = vadd.f32 %v302_v21, %v282_v51  ;;  %v327_v59 = vadd.f32 %v302_v21, %v283_v26  ;;  %v328_v39 = vadd.f32 %v302_v21, %v284_v53 }
  0x6b   :  { %353 = vst.msk [vmem:[%s905_s3 + $0x80] sm:$0xff] %vm46_vm0, %v321_v56  ;;  %354 = vst.msk [vmem:[%s905_s3 + $0x88] sm:$0xff] %vm46_vm0, %v322_v15  ;;  %v329_v50 = vadd.f32 %v302_v21, %v285_v12  ;;  %v330_v5 = vadd.f32 %v302_v21, %v286_v37  ;;  %v331_v18 = vadd.f32 %v302_v21, %v287_v41 }
  0x6c   :  { %355 = vst.msk [vmem:[%s905_s3 + $0x90] sm:$0xff] %vm46_vm0, %v323_v57  ;;  %356 = vst.msk [vmem:[%s905_s3 + $0x98] sm:$0xff] %vm46_vm0, %v324_v27  ;;  %v332_v32 = vadd.f32 %v302_v21, %v288_v42  ;;  %v333_v48 = vadd.f32 %v302_v21, %v289_v52  ;;  %v334_v62 = vadd.f32 %v302_v21, %v290_v63 }
  0x6d   :  { %357 = vst.msk [vmem:[%s905_s3 + $0xa0] sm:$0xff] %vm46_vm0, %v325_v35  ;;  %358 = vst.msk [vmem:[%s905_s3 + $0xa8] sm:$0xff] %vm46_vm0, %v326_v34  ;;  %v291_v60 = vmul.f32 %v258_v38, %v678_v17  ;;  %v292_v4 = vmul.f32 %v258_v38, %v688_v28 }
  0x6e   :  { %359 = vst.msk [vmem:[%s905_s3 + $0xb0] sm:$0xff] %vm46_vm0, %v327_v59  ;;  %360 = vst.msk [vmem:[%s905_s3 + $0xb8] sm:$0xff] %vm46_vm0, %v328_v39 }
  0x6f   :  { %361 = vst.msk [vmem:[%s905_s3 + $0xc0] sm:$0xff] %vm46_vm0, %v329_v50  ;;  %362 = vst.msk [vmem:[%s905_s3 + $0xc8] sm:$0xff] %vm46_vm0, %v330_v5  ;;  %v335_v17 = vadd.f32 %v302_v21, %v291_v60  ;;  %v336_v28 = vadd.f32 %v302_v21, %v292_v4 }
  0x70   :  { %363 = vst.msk [vmem:[%s905_s3 + $0xd0] sm:$0xff] %vm46_vm0, %v331_v18  ;;  %364 = vst.msk [vmem:[%s905_s3 + $0xd8] sm:$0xff] %vm46_vm0, %v332_v32 }
  0x71   :  { %365 = vst.msk [vmem:[%s905_s3 + $0xe0] sm:$0xff] %vm46_vm0, %v333_v48  ;;  %366 = vst.msk [vmem:[%s905_s3 + $0xe8] sm:$0xff] %vm46_vm0, %v334_v62 }
  0x72   :  { %367 = vst.msk [vmem:[%s905_s3 + $0xf0] sm:$0xff] %vm46_vm0, %v335_v17  ;;  %368 = vst.msk [vmem:[%s905_s3 + $0xf8] sm:$0xff] %vm46_vm0, %v336_v28 }

</bundles_post_ra>
